<compile_context>
chip_gen: v5e
topology: v5e:2x2
jax: 0.10.0
libtpu: 0.0.40
codegen_flags: <defaults>
</compile_context>

<pallas_src>
import functools

import jax
import jax.numpy as jnp
from jax.experimental import pallas as pl
from jax.experimental.pallas import tpu as pltpu

IN_FEATURES = 3             # features of x1
CAT_IN = 3 * IN_FEATURES    # 9  (features of b1 = cat([x1,x1,x1], dim=1))
OUT_FEATURES = 8            # Linear output features
CAT_OUT = 3 * OUT_FEATURES  # 24 (features of v3 = cat([v1,v1,v1], dim=1))

LANE = 128


def _round_up(n, m):
    return ((n + m - 1) // m) * m


def _linear_t_kernel(wb_ref, x_ref, o_ref):
    """o[f, n] = sum_k W_eff[f, k] * x[k, n] + bias[f].

    wb_ref: (8, 4) resident VMEM block, [:, :3] = W_eff, [:, 3] = bias.
    x_ref : (3, TB) lane-dense input tile (batch on lanes).
    o_ref : (8, TB) lane-dense output tile.
    Pure VPU broadcast-FMAs; no MXU, no cross-lane shuffles.
    """
    # bias broadcast (8,1) -> (8,TB): lane broadcast, done once per tile.
    acc = jnp.broadcast_to(wb_ref[:, IN_FEATURES:IN_FEATURES + 1], o_ref.shape)
    for k in range(IN_FEATURES):  # unrolled at trace time (3 FMAs)
        acc = acc + wb_ref[:, k:k + 1] * x_ref[k:k + 1, :]
    o_ref[...] = acc


@functools.partial(jax.jit, static_argnames=("tb", "force_pallas"))
def model_forward(x1, weight, bias, *, tb=32768, force_pallas=False):
    """x1: (B, 3) f32; weight: (8, 9) f32 (PyTorch layout); bias: (8,) f32."""
    B = x1.shape[0]

    # Fold the input concatenation into the weight (mathematically identical
    # because the three concatenated blocks are the same x).
    w_eff = (weight[:, 0:IN_FEATURES]
             + weight[:, IN_FEATURES:2 * IN_FEATURES]
             + weight[:, 2 * IN_FEATURES:3 * IN_FEATURES])      # (8, 3)

    # Small-batch fallback: a single fused XLA pass beats the pallas_call floor.
    if not force_pallas and B < 2048:
        v1 = x1 @ w_eff.T + bias
        return jnp.tile(v1, (1, 3))

    # --- Pallas path: transposed, lane-dense ---
    wb = jnp.concatenate([w_eff, bias.reshape(OUT_FEATURES, 1)], axis=1)  # (8, 4)

    # Batch tile on the lane axis. Keep >= 2 tiles whenever B allows (v7x 2-TC
    # sharding), capped at `tb` lanes per tile.
    tb = max(LANE, _round_up(tb, LANE))
    TB = min(tb, _round_up((B + 1) // 2, LANE))
    Bp = _round_up(B, TB)

    xT = x1.T                                      # (3, B) lane-dense layout
    if Bp != B:
        xT = jnp.pad(xT, ((0, 0), (0, Bp - B)))    # pad batch (sliced off below)

    grid = (Bp // TB,)

    # VMEM: input block pads 3 -> 8 sublanes; output block is 8 sublanes.
    # Both double-buffered, f32.
    block_bytes = 2 * (8 * TB * 4 + 8 * TB * 4)
    vmem_bytes = min(max(block_bytes + (2 << 20), 16 << 20), 48 << 20)

    outT = pl.pallas_call(
        _linear_t_kernel,
        out_shape=jax.ShapeDtypeStruct((OUT_FEATURES, Bp), jnp.float32),
        grid=grid,
        in_specs=[
            # [W_eff | bias]: one tiny resident block, fetched once.
            pl.BlockSpec((OUT_FEATURES, IN_FEATURES + 1), lambda i: (0, 0)),
            # lane-dense input slab: (3, TB)
            pl.BlockSpec((IN_FEATURES, TB), lambda i: (0, i)),
        ],
        # lane-dense output slab: (8, TB) -> unmasked full-lane stores.
        out_specs=pl.BlockSpec((OUT_FEATURES, TB), lambda i: (0, i)),
        compiler_params=pltpu.CompilerParams(
            dimension_semantics=("parallel",),
            vmem_limit_bytes=vmem_bytes,
        ),
    )(wb, xT)

    v1 = outT[:, :B].T               # (B, 8): drop batch padding, back to row-major
    # v3 = cat([v1, v1, v1], dim=1); replication left to XLA so the kernel
    # writes each output byte exactly once (slice+transpose+tile fuse).
    return jnp.tile(v1, (1, 3))


def reference_forward(x1, weight, bias):
    b1 = jnp.concatenate([x1, x1, x1], axis=1)
    v1 = b1 @ weight.T + bias
    return jnp.concatenate([v1, v1, v1], axis=1)


if __name__ == "__main__":
    key = jax.random.PRNGKey(0)
    k_x, k_w, k_b, k_x2 = jax.random.split(key, 4)

    # Deterministic PyTorch-like init: uniform(-1/sqrt(fan_in), 1/sqrt(fan_in)).
    bound = 1.0 / (CAT_IN ** 0.5)
    weight = jax.random.uniform(k_w, (OUT_FEATURES, CAT_IN), dtype=jnp.float32,
                                minval=-bound, maxval=bound)
    bias = jax.random.uniform(k_b, (OUT_FEATURES,), dtype=jnp.float32,
                              minval=-bound, maxval=bound)

    # Module-scale shape (batch=2, 3 features); force the Pallas path so the
    # kernel actually runs.
    B = 2
    x1 = jax.random.normal(k_x, (B, IN_FEATURES), dtype=jnp.float32)
    out = jax.block_until_ready(model_forward(x1, weight, bias, force_pallas=True))
    ref = reference_forward(x1, weight, bias)
    assert out.shape == (B, CAT_OUT), out.shape
    assert jnp.allclose(out, ref, atol=1e-5, rtol=1e-5), "mismatch vs reference (B=2)"

    # Multi-tile grid (>=2 blocks) + batch-padding check, still small.
    B2 = 300
    x2 = jax.random.normal(k_x2, (B2, IN_FEATURES), dtype=jnp.float32)
    out2 = jax.block_until_ready(model_forward(x2, weight, bias, force_pallas=True))
    ref2 = reference_forward(x2, weight, bias)
    assert out2.shape == (B2, CAT_OUT), out2.shape
    assert jnp.allclose(out2, ref2, atol=1e-5, rtol=1e-5), "mismatch vs reference (B=300)"

    # Small-batch pure-XLA fallback path.
    out3 = jax.block_until_ready(model_forward(x1, weight, bias))
    assert jnp.allclose(out3, ref, atol=1e-5, rtol=1e-5), "mismatch vs reference (fallback)"

    print("KERNEL_OK")
</pallas_src>

<mosaic_0001>
module attributes {stable_mosaic.version = 11 : i64} {
  func.func @_linear_t_kernel(%arg0: i32, %arg1: memref<8x4xf32, #tpu.memory_space<vmem>>, %arg2: memref<3x128xf32, #tpu.memory_space<vmem>>, %arg3: memref<8x128xf32, #tpu.memory_space<vmem>>) attributes {dimension_semantics = [#tpu.dimension_semantics<parallel>], iteration_bounds = array<i64: 1>, scalar_prefetch = 0 : i64, scratch_operands = 0 : i64, tpu.core_type = #tpu.core_type<tc>, window_params = [{pipeline_mode = #tpu.pipeline_mode<synchronous>, transform_indices = @transform_0, window_bounds = array<i64: 8, 4>}, {transform_indices = @transform_1, window_bounds = array<i64: 3, 128>}, {transform_indices = @transform_2, window_bounds = array<i64: 8, 128>}]} {
    %c0 = arith.constant 0 : index
    %c3 = arith.constant 3 : index
    %0 = vector.load %arg1[%c0, %c3] : memref<8x4xf32, #tpu.memory_space<vmem>>, vector<8x1xf32>
    %1 = vector.shape_cast %0 : vector<8x1xf32> to vector<8x1xf32>
    %2 = vector.broadcast %1 : vector<8x1xf32> to vector<8x128xf32>
    %c0_0 = arith.constant 0 : index
    %c0_1 = arith.constant 0 : index
    %3 = vector.load %arg1[%c0_0, %c0_1] : memref<8x4xf32, #tpu.memory_space<vmem>>, vector<8x1xf32>
    %c0_2 = arith.constant 0 : index
    %c0_3 = arith.constant 0 : index
    %4 = vector.load %arg2[%c0_2, %c0_3] : memref<3x128xf32, #tpu.memory_space<vmem>>, vector<1x128xf32>
    %5 = vector.broadcast %3 : vector<8x1xf32> to vector<8x128xf32>
    %6 = vector.broadcast %4 : vector<1x128xf32> to vector<8x128xf32>
    %7 = arith.mulf %5, %6 : vector<8x128xf32>
    %8 = arith.addf %2, %7 : vector<8x128xf32>
    %c0_4 = arith.constant 0 : index
    %c1 = arith.constant 1 : index
    %9 = vector.load %arg1[%c0_4, %c1] : memref<8x4xf32, #tpu.memory_space<vmem>>, vector<8x1xf32>
    %c1_5 = arith.constant 1 : index
    %c0_6 = arith.constant 0 : index
    %10 = vector.load %arg2[%c1_5, %c0_6] : memref<3x128xf32, #tpu.memory_space<vmem>>, vector<1x128xf32>
    %11 = vector.broadcast %9 : vector<8x1xf32> to vector<8x128xf32>
    %12 = vector.broadcast %10 : vector<1x128xf32> to vector<8x128xf32>
    %13 = arith.mulf %11, %12 : vector<8x128xf32>
    %14 = arith.addf %8, %13 : vector<8x128xf32>
    %c0_7 = arith.constant 0 : index
    %c2 = arith.constant 2 : index
    %15 = vector.load %arg1[%c0_7, %c2] : memref<8x4xf32, #tpu.memory_space<vmem>>, vector<8x1xf32>
    %c2_8 = arith.constant 2 : index
    %c0_9 = arith.constant 0 : index
    %16 = vector.load %arg2[%c2_8, %c0_9] : memref<3x128xf32, #tpu.memory_space<vmem>>, vector<1x128xf32>
    %17 = vector.broadcast %15 : vector<8x1xf32> to vector<8x128xf32>
    %18 = vector.broadcast %16 : vector<1x128xf32> to vector<8x128xf32>
    %19 = arith.mulf %17, %18 : vector<8x128xf32>
    %20 = arith.addf %14, %19 : vector<8x128xf32>
    %c0_10 = arith.constant 0 : index
    %c0_11 = arith.constant 0 : index
    %21 = vector.load %arg3[%c0_10, %c0_11] : memref<8x128xf32, #tpu.memory_space<vmem>>, vector<8x128xf32>
    tpu.vector_store %arg3[%c0_10, %c0_11], %20 {strides = array<i32>} : memref<8x128xf32, #tpu.memory_space<vmem>>, vector<8x128xf32>,
    return
  }
  func.func @transform_0(%arg0: i32) -> (i32, i32) {
    %c0_i32 = arith.constant 0 : i32
    %c0_i32_0 = arith.constant 0 : i32
    %c0_i32_1 = arith.constant 0 : i32
    return %c0_i32, %c0_i32_0 : i32, i32
  }
  func.func @transform_1(%arg0: i32) -> (i32, i32) {
    %c0_i32 = arith.constant 0 : i32
    %c0_i32_0 = arith.constant 0 : i32
    return %c0_i32, %arg0 : i32, i32
  }
  func.func @transform_2(%arg0: i32) -> (i32, i32) {
    %c0_i32 = arith.constant 0 : i32
    %c0_i32_0 = arith.constant 0 : i32
    return %c0_i32, %arg0 : i32, i32
  }
}

</mosaic_0001>

<bundles_post_ra>
// kernel: tile.9
= control target key start
LH: loop header
LB: loop body
LE: loop exit
PB: predicated region body
PF: predicated region fallthrough
CT: control target
= control target key end

     0   :  { %s99_s0 = inlined_call_operand.vmem [shape: f32[2,3,8], index: 0, kind: input, shape index: {}]   ;;  %s100_s1 = inlined_call_operand.hbm [shape: f32[2,24], index: 1, kind: output, shape index: {}]  }
   0x1   :  { %v47_v0 = vld [vmem:[%s99_s0 + $0x4] sm:$0xf]  ;;  %v9_v1 = vld [vmem:[%s99_s0] sm:$0xf] }
   0x2   :  { %8 = vst [vmem:[#allocation3 + $0x8] sm:$0xf] %v47_v0 }
   0x3   :  { %10 = vst [vmem:[#allocation3] sm:$0xf] %v9_v1 }
   0x4   :  { %2 = vsyncpa [#allocation1], 0  ;;  %s16_s0 = smov 3  ;;  %s77_s10 = smov 16   ;;  %vm13_vm0 = vcmask 64512   ;;  %vm20_vm1 = vcmask 195712  }
   0x5   :  { %s23_s11 = smov 3  ;;  %s78_s12 = smov 8   ;;  %vm27_vm2 = vcmask 130112  }
   0x6   :  { %s11_s13 = smov 3  ;;  %s79_s14 = smov [#allocation0]  }
   0x7   :  { %s38_s15 = sshll.u32 %s79_s14, 4  ;;  %s40_s1 = sshll.u32 %s100_s1, 4  ;;  %s39_s15 = int_to_ptr.vmem [resolvable:$true] %s38_s15  ;;  %s41_s1 = int_to_ptr.hbm [resolvable:$true] %s40_s1 }
   0xa   :  { %v17_v2 = vld [vmem:[#allocation3 + $0x2] ss:$8 sm:%s16_s0]   ;;  %v24_v3 = vld [vmem:[#allocation3 + $0x1] ss:$8 sm:%s23_s11]   ;;  %v12_v4 = vld [vmem:[#allocation3] ss:$8 sm:%s11_s13]  }
   0xb   :  { %18 = vrot.lane.b32.xlu0 %v17_v2, %s77_s10  ;;  %14 = vst.msk [vmem:[#allocation2] sm:$0x3] %vm13_vm0, %v12_v4  }
  0x13   :  { %25 = vrot.lane.b32.xlu0 %v24_v3, %s78_s12 }
  0x7d   :  { %v19_v5 = vpop.permute.xlu0 %18  }
  0x7e   :  { %21 = vst.msk [vmem:[#allocation2] sm:$0x3] %vm20_vm1, %v19_v5  }
  0x85   :  { %v26_v6 = vpop.permute.xlu0 %25  }
  0x86   :  { %28 = vst.msk [vmem:[#allocation2] sm:$0x3] %vm27_vm2, %v26_v6  }
  0x8d   :  { %v31_v7 = vld [vmem:[#allocation2] sm:$0x3] }
  0x8e   :  { %34 = vst [vmem:[#allocation0] sm:$0x3] %v31_v7 }
  0x8f   :  { %43 = dma.vmem_to_hbm [thread:$0]  %s39_s15, 32, %s41_s1, [#allocation1]  }
  0x90   :  { %75 = dma.done.wait [#allocation1], 32  }
  0x91   :  { %76 = vsyncadd [#allocation1], 4294967264 }
  0x92   :  { %46 = vsyncpa [#allocation1], 1 }

// kernel: model_forward.1
= control target key start
LH: loop header
LB: loop body
LE: loop exit
PB: predicated region body
PF: predicated region fallthrough
CT: control target
= control target key end

     0   :  { %v58_v0 = vmov 0   ;;  %v59_v2 = vmov 1   ;;  %v60_v3 = vmov 3   ;;  %v61_v4 = vmov 2   ;;  %s92_s0 = inlined_call_operand.vmem [shape: f32[8,4], index: 0, kind: input, shape index: {}]   ;;  %s93_s1 = inlined_call_operand.vmem [shape: f32[3,128], index: 1, kind: input, shape index: {}]   ;;  %s94_s2 = inlined_call_operand.vmem [shape: f32[8,128], index: 2, kind: output, shape index: {}]  }
   0x1   :  { %50 = vset.pattern.permute.xlu0 %v58_v0  ;;  %v11_v1 = vld [vmem:[%s92_s0] sm:$0xff]  ;;  %52 = vset.pattern.permute.xlu1 %v59_v2 }
   0x2   :  { %19 = vperm.xlu0 %50, %v11_v1   ;;  %27 = vperm.xlu1 %52, %v11_v1   ;;  %v55_v7 = vld [vmem:[%s93_s1] ss:$0 sm:$0xff]  ;;  %v56_v8 = vld [vmem:[%s93_s1 + $0x1] ss:$0 sm:$0xff]  ;;  %v57_v9 = vld [vmem:[%s93_s1 + $0x2] ss:$0 sm:$0xff] }
   0xa   :  { %51 = vset.pattern.permute.xlu0 %v60_v3  ;;  %53 = vset.pattern.permute.xlu1 %v61_v4 }
   0xb   :  { %14 = vperm.xlu0 %51, %v11_v1   ;;  %35 = vperm.xlu1 %53, %v11_v1  }
  0x13   :  { %54 = vset.pattern.permute.xlu0 %v61_v4 }
  0x74   :  { %v20_v5 = vpop.permute.xlu0 %19  ;;  %v28_v6 = vpop.permute.xlu1 %27 }
  0x75   :  { %v23_v10 = vmul.f32 %v55_v7, %v20_v5  ;;  %v31_v13 = vmul.f32 %v56_v8, %v28_v6 }
  0x7d   :  { %v15_v11 = vpop.permute.xlu0 %14  ;;  %v36_v12 = vpop.permute.xlu1 %35 }
  0x7e   :  { %v24_v14 = vadd.f32 %v23_v10, %v15_v11  ;;  %v39_v15 = vmul.f32 %v57_v9, %v36_v12 }
  0x80   :  { %v32_v16 = vadd.f32 %v31_v13, %v24_v14 }
  0x82   :  { %v40_v17 = vadd.f32 %v39_v15, %v32_v16 }
  0x84   :  { %41 = vst [vmem:[%s94_s2] sm:$0xff] %v40_v17 }

</bundles_post_ra>
